<compile_context>
chip_gen: v7x
topology: tpu7x:2x2x1
jax: 0.10.0
libtpu: 0.0.40
codegen_flags: <defaults>
</compile_context>

<pallas_src>
import functools

import jax
import jax.numpy as jnp
from jax.experimental import pallas as pl
from jax.experimental.pallas import tpu as pltpu


def convlstm_kernel(x_ref, hx_ref, cx_ref, w_ref, hy_ref, cy_ref, *, w_img):
    # x_ref : (Cin_p, L)   hx_ref/cx_ref : (Chid, L)   w_ref : (4*Chid, K)
    L = x_ref.shape[-1]
    chid = cx_ref.shape[0]

    x = x_ref[...]           # (Cin_p, L)
    h = hx_ref[...]          # (Chid, L)

    # Column index within a W-row (tile_l is a multiple of W, tiles are W-aligned).
    col = jax.lax.broadcasted_iota(jnp.int32, (1, L), 1) % w_img
    has_prev = col != 0            # w-1 neighbour exists (else conv zero-pad)
    has_next = col != (w_img - 1)  # w+1 neighbour exists

    def prev_tap(a):   # a[:, p-1], zeroed at w == 0 (also kills roll wrap-around)
        return jnp.where(has_prev, pltpu.roll(a, 1, axis=1), 0.0)

    def next_tap(a):   # a[:, p+1], zeroed at w == W-1
        return jnp.where(has_next, pltpu.roll(a, L - 1, axis=1), 0.0)

    # K-stack along sublanes (every piece is a multiple of 8 rows -> aligned concat).
    xk = jnp.concatenate([prev_tap(x), x, prev_tap(h), h, next_tap(h)], axis=0)

    # Single fused matmul on the MXU: (G, K) @ (K, L) -> (G, L), f32 accumulate.
    gates = jnp.dot(w_ref[...], xk, preferred_element_type=jnp.float32)

    ingate = jax.nn.sigmoid(gates[0 * chid:1 * chid])
    forgetgate = jax.nn.sigmoid(gates[1 * chid:2 * chid])
    cellgate = jnp.tanh(gates[2 * chid:3 * chid])
    outgate = jax.nn.sigmoid(gates[3 * chid:4 * chid])

    cx = cx_ref[...].astype(jnp.float32)
    cy = forgetgate * cx + ingate * cellgate
    hy = outgate * jnp.tanh(cy)

    hy_ref[...] = hy.astype(hy_ref.dtype)
    cy_ref[...] = cy.astype(cy_ref.dtype)


def conv_lstm_cell(x_nchw, hx_nchw, cx_nchw, w_ih_masked, w_hh, *, tile_l=None):
    """w_ih_masked / w_hh are PyTorch-style conv weights: (4*Chid, Cin/Chid, 1, 3).

    Layout is native NCHW: arrays are only reshaped (N, C, H*W); channels live on
    sublanes, flattened spatial on lanes.
    """
    N, Cin, H, W = x_nchw.shape
    Chid = hx_nchw.shape[1]
    G = 4 * Chid
    HW = H * W
    assert Chid % 8 == 0, "hidden_channels must be a multiple of the 8-sublane tile"

    Cin_p = ((Cin + 7) // 8) * 8          # pad input channels to a sublane tile
    Kp = 2 * Cin_p + 3 * Chid             # masked x 'future' tap dropped

    # Pick the largest lane tile <= 4096 that divides H*W, is a multiple of W
    # (so W-boundary masks are tile-local) and of 128 (lane-dense). The cap keeps
    # the double-buffered working set tiny even under v7x's 32 MiB scoped VMEM.
    if tile_l is None:
        tile_l = HW
        for d in range(min(HW, 4096), 127, -1):
            if HW % d == 0 and d % W == 0 and d % 128 == 0:
                tile_l = d
                break
    assert HW % tile_l == 0 and tile_l % W == 0

    x = x_nchw.reshape(N, Cin, HW)
    if Cin_p != Cin:
        x = jnp.pad(x, ((0, 0), (0, Cin_p - Cin), (0, 0)))
    hx = hx_nchw.reshape(N, Chid, HW)
    cx = cx_nchw.reshape(N, Chid, HW)

    # Fused, resident weight (G, Kp). Column order must match the in-kernel stack:
    # [x tap0 (w-1), x tap1 (w), h tap0, h tap1, h tap2]. w_ih[..., 2] is dropped
    # because the PixelCNN 'B' spatial mask zeroes it.
    def padc(w2, width):
        return jnp.pad(w2, ((0, 0), (0, width - w2.shape[1])))

    w_fused = jnp.concatenate([
        padc(w_ih_masked[:, :, 0, 0], Cin_p),
        padc(w_ih_masked[:, :, 0, 1], Cin_p),
        w_hh[:, :, 0, 0],
        w_hh[:, :, 0, 1],
        w_hh[:, :, 0, 2],
    ], axis=1).astype(x.dtype)            # (G, Kp)

    kernel = functools.partial(convlstm_kernel, w_img=W)

    hy, cy = pl.pallas_call(
        kernel,
        out_shape=(jax.ShapeDtypeStruct((N, Chid, HW), x_nchw.dtype),
                   jax.ShapeDtypeStruct((N, Chid, HW), x_nchw.dtype)),
        grid_spec=pltpu.PrefetchScalarGridSpec(
            num_scalar_prefetch=0,
            grid=(N, HW // tile_l),
            in_specs=[
                pl.BlockSpec((None, Cin_p, tile_l), lambda n, s: (n, 0, s)),
                pl.BlockSpec((None, Chid, tile_l), lambda n, s: (n, 0, s)),
                pl.BlockSpec((None, Chid, tile_l), lambda n, s: (n, 0, s)),
                pl.BlockSpec((G, Kp), lambda n, s: (0, 0)),   # weights stay resident
            ],
            out_specs=[
                pl.BlockSpec((None, Chid, tile_l), lambda n, s: (n, 0, s)),
                pl.BlockSpec((None, Chid, tile_l), lambda n, s: (n, 0, s)),
            ],
        ),
        compiler_params=pltpu.CompilerParams(
            dimension_semantics=("parallel", "parallel")),
    )(x, hx, cx, w_fused)

    return hy.reshape(N, Chid, H, W), cy.reshape(N, Chid, H, W)


def ref_forward(x, hx, cx, w_ih_masked, w_hh):
    dn = ('NCHW', 'OIHW', 'NCHW')
    gates = jax.lax.conv_general_dilated(
        x, w_ih_masked, (1, 1), [(0, 0), (1, 1)], dimension_numbers=dn)
    gates = gates + jax.lax.conv_general_dilated(
        hx, w_hh, (1, 1), [(0, 0), (1, 1)], dimension_numbers=dn)
    i, f, g, o = jnp.split(gates, 4, axis=1)
    cy = jax.nn.sigmoid(f) * cx + jax.nn.sigmoid(i) * jnp.tanh(g)
    hy = jax.nn.sigmoid(o) * jnp.tanh(cy)
    return hy, cy


if __name__ == "__main__":
    N, Cin, H, W = 2, 4, 16, 16
    Chid = 8
    G = 4 * Chid

    key = jax.random.PRNGKey(0)
    kx, kh, kc, kwi, kwh = jax.random.split(key, 5)

    x = jax.random.normal(kx, (N, Cin, H, W), jnp.float32)
    hx = jax.random.normal(kh, (N, Chid, H, W), jnp.float32)
    cx = jax.random.normal(kc, (N, Chid, H, W), jnp.float32)

    # deterministic parameter init (conv weights, bias=False in the module)
    w_ih = jax.random.normal(kwi, (G, Cin, 1, 3), jnp.float32) * 0.1
    w_hh = jax.random.normal(kwh, (G, Chid, 1, 3), jnp.float32) * 0.1

    # PixelCNN mask type 'B' for a [1,3] kernel: zero the strictly-future tap.
    mask = jnp.array([1.0, 1.0, 0.0], jnp.float32).reshape(1, 1, 1, 3)
    w_ih_masked = w_ih * mask

    hy, cy = conv_lstm_cell(x, hx, cx, w_ih_masked, w_hh)
    jax.block_until_ready((hy, cy))

    hy_ref, cy_ref = ref_forward(x, hx, cx, w_ih_masked, w_hh)
    assert jnp.allclose(hy, hy_ref, atol=1e-5, rtol=1e-5)
    assert jnp.allclose(cy, cy_ref, atol=1e-5, rtol=1e-5)

    print("KERNEL_OK")
</pallas_src>

<mosaic_0001>
module attributes {stable_mosaic.version = 11 : i64} {
  func.func @convlstm_kernel(%arg0: i32, %arg1: i32, %arg2: memref<1x8x256xf32, #tpu.memory_space<vmem>>, %arg3: memref<1x8x256xf32, #tpu.memory_space<vmem>>, %arg4: memref<1x8x256xf32, #tpu.memory_space<vmem>>, %arg5: memref<32x40xf32, #tpu.memory_space<vmem>>, %arg6: memref<1x8x256xf32, #tpu.memory_space<vmem>>, %arg7: memref<1x8x256xf32, #tpu.memory_space<vmem>>) attributes {dimension_semantics = [#tpu.dimension_semantics<parallel>, #tpu.dimension_semantics<parallel>], iteration_bounds = array<i64: 2, 1>, scalar_prefetch = 0 : i64, scratch_operands = 0 : i64, tpu.core_type = #tpu.core_type<tc>, window_params = [{transform_indices = @transform_0, window_bounds = array<i64: 1, 8, 256>}, {transform_indices = @transform_1, window_bounds = array<i64: 1, 8, 256>}, {transform_indices = @transform_2, window_bounds = array<i64: 1, 8, 256>}, {pipeline_mode = #tpu.pipeline_mode<synchronous>, transform_indices = @transform_3, window_bounds = array<i64: 32, 40>}, {transform_indices = @transform_4, window_bounds = array<i64: 1, 8, 256>}, {transform_indices = @transform_5, window_bounds = array<i64: 1, 8, 256>}]} {
    %c0 = arith.constant 0 : index
    %c0_0 = arith.constant 0 : index
    %c0_1 = arith.constant 0 : index
    %0 = vector.load %arg2[%c0, %c0_0, %c0_1] : memref<1x8x256xf32, #tpu.memory_space<vmem>>, vector<1x8x256xf32>
    %1 = vector.shape_cast %0 : vector<1x8x256xf32> to vector<8x256xf32>
    %c0_2 = arith.constant 0 : index
    %c0_3 = arith.constant 0 : index
    %c0_4 = arith.constant 0 : index
    %2 = vector.load %arg3[%c0_2, %c0_3, %c0_4] : memref<1x8x256xf32, #tpu.memory_space<vmem>>, vector<1x8x256xf32>
    %3 = vector.shape_cast %2 : vector<1x8x256xf32> to vector<8x256xf32>
    %4 = tpu.iota {dimensions = array<i32: 1>} : vector<1x256xi32>
    %c16_i32 = arith.constant 16 : i32
    %c0_i32 = arith.constant 0 : i32
    %5 = arith.cmpi eq, %c16_i32, %c0_i32 : i32
    %c1_i32 = arith.constant 1 : i32
    %6 = arith.select %5, %c1_i32, %c16_i32 : i32
    %7 = vector.broadcast %6 : i32 to vector<1x256xi32>
    %8 = arith.remsi %4, %7 : vector<1x256xi32>
    %c0_i32_5 = arith.constant 0 : i32
    %9 = vector.broadcast %c0_i32_5 : i32 to vector<1x256xi32>
    %10 = arith.cmpi ne, %8, %9 : vector<1x256xi32>
    %c0_i32_6 = arith.constant 0 : i32
    %11 = vector.broadcast %c0_i32_6 : i32 to vector<1x256xi32>
    %12 = arith.cmpi slt, %8, %11 : vector<1x256xi32>
    %c0_i32_7 = arith.constant 0 : i32
    %13 = arith.cmpi slt, %6, %c0_i32_7 : i32
    %14 = vector.broadcast %13 : i1 to vector<1x256xi1>
    %15 = vector.broadcast %14 : vector<1x256xi1> to vector<1x256xi1>
    %16 = arith.xori %12, %15 : vector<1x256xi1>
    %17 = arith.andi %16, %10 : vector<1x256xi1>
    %18 = vector.broadcast %6 : i32 to vector<1x256xi32>
    %19 = arith.addi %8, %18 : vector<1x256xi32>
    %20 = arith.select %17, %19, %8 : vector<1x256xi1>, vector<1x256xi32>
    %c0_i32_8 = arith.constant 0 : i32
    %21 = vector.broadcast %c0_i32_8 : i32 to vector<1x256xi32>
    %22 = arith.cmpi ne, %20, %21 : vector<1x256xi32>
    %c15_i32 = arith.constant 15 : i32
    %23 = vector.broadcast %c15_i32 : i32 to vector<1x256xi32>
    %24 = arith.cmpi ne, %20, %23 : vector<1x256xi32>
    %c1_i32_9 = arith.constant 1 : i32
    %25 = tpu.dynamic_rotate %1 by %c1_i32_9 dim 1 : vector<8x256xf32>, i32 -> vector<8x256xf32>
    %cst = arith.constant 0.000000e+00 : f32
    %26 = vector.shape_cast %22 : vector<1x256xi1> to vector<1x256xi1>
    %27 = vector.broadcast %26 : vector<1x256xi1> to vector<8x256xi1>
    %28 = vector.broadcast %cst : f32 to vector<8x256xf32>
    %29 = arith.select %27, %25, %28 : vector<8x256xi1>, vector<8x256xf32>
    %c1_i32_10 = arith.constant 1 : i32
    %30 = tpu.dynamic_rotate %3 by %c1_i32_10 dim 1 : vector<8x256xf32>, i32 -> vector<8x256xf32>
    %cst_11 = arith.constant 0.000000e+00 : f32
    %31 = vector.shape_cast %22 : vector<1x256xi1> to vector<1x256xi1>
    %32 = vector.broadcast %31 : vector<1x256xi1> to vector<8x256xi1>
    %33 = vector.broadcast %cst_11 : f32 to vector<8x256xf32>
    %34 = arith.select %32, %30, %33 : vector<8x256xi1>, vector<8x256xf32>
    %c255_i32 = arith.constant 255 : i32
    %35 = tpu.dynamic_rotate %3 by %c255_i32 dim 1 : vector<8x256xf32>, i32 -> vector<8x256xf32>
    %cst_12 = arith.constant 0.000000e+00 : f32
    %36 = vector.shape_cast %24 : vector<1x256xi1> to vector<1x256xi1>
    %37 = vector.broadcast %36 : vector<1x256xi1> to vector<8x256xi1>
    %38 = vector.broadcast %cst_12 : f32 to vector<8x256xf32>
    %39 = arith.select %37, %35, %38 : vector<8x256xi1>, vector<8x256xf32>
    %40 = tpu.concatenate %29, %1, %34, %3, %39 in 0 : vector<8x256xf32>, vector<8x256xf32>, vector<8x256xf32>, vector<8x256xf32>, vector<8x256xf32> -> vector<40x256xf32>
    %c0_13 = arith.constant 0 : index
    %c0_14 = arith.constant 0 : index
    %41 = vector.load %arg5[%c0_13, %c0_14] : memref<32x40xf32, #tpu.memory_space<vmem>>, vector<32x40xf32>
    %cst_15 = arith.constant dense<0.000000e+00> : vector<32x256xf32>
    %42 = tpu.matmul %41, %40, %cst_15 {dimension_numbers = #tpu.dot_dimension_numbers<[1], [0], [0], [1], [0, 0, 1, 1], [], []>} : vector<32x40xf32>, vector<40x256xf32>, vector<32x256xf32> -> vector<32x256xf32>
    %43 = vector.extract_strided_slice %42 {offsets = [0, 0], sizes = [8, 256], strides = [1, 1]} : vector<32x256xf32> to vector<8x256xf32>
    %44 = arith.negf %43 : vector<8x256xf32>
    %45 = math.exp %44 : vector<8x256xf32>
    %cst_16 = arith.constant 1.000000e+00 : f32
    %46 = vector.broadcast %cst_16 : f32 to vector<8x256xf32>
    %47 = arith.addf %46, %45 : vector<8x256xf32>
    %48 = arith.divf %46, %47 : vector<8x256xf32>
    %49 = vector.extract_strided_slice %42 {offsets = [8, 0], sizes = [8, 256], strides = [1, 1]} : vector<32x256xf32> to vector<8x256xf32>
    %50 = arith.negf %49 : vector<8x256xf32>
    %51 = math.exp %50 : vector<8x256xf32>
    %cst_17 = arith.constant 1.000000e+00 : f32
    %52 = vector.broadcast %cst_17 : f32 to vector<8x256xf32>
    %53 = arith.addf %52, %51 : vector<8x256xf32>
    %54 = arith.divf %52, %53 : vector<8x256xf32>
    %55 = vector.extract_strided_slice %42 {offsets = [16, 0], sizes = [8, 256], strides = [1, 1]} : vector<32x256xf32> to vector<8x256xf32>
    %56 = math.tanh %55 : vector<8x256xf32>
    %57 = vector.extract_strided_slice %42 {offsets = [24, 0], sizes = [8, 256], strides = [1, 1]} : vector<32x256xf32> to vector<8x256xf32>
    %58 = arith.negf %57 : vector<8x256xf32>
    %59 = math.exp %58 : vector<8x256xf32>
    %cst_18 = arith.constant 1.000000e+00 : f32
    %60 = vector.broadcast %cst_18 : f32 to vector<8x256xf32>
    %61 = arith.addf %60, %59 : vector<8x256xf32>
    %62 = arith.divf %60, %61 : vector<8x256xf32>
    %c0_19 = arith.constant 0 : index
    %c0_20 = arith.constant 0 : index
    %c0_21 = arith.constant 0 : index
    %63 = vector.load %arg4[%c0_19, %c0_20, %c0_21] : memref<1x8x256xf32, #tpu.memory_space<vmem>>, vector<1x8x256xf32>
    %64 = vector.shape_cast %63 : vector<1x8x256xf32> to vector<8x256xf32>
    %65 = arith.mulf %54, %64 : vector<8x256xf32>
    %66 = arith.mulf %48, %56 : vector<8x256xf32>
    %67 = arith.addf %65, %66 : vector<8x256xf32>
    %68 = math.tanh %67 : vector<8x256xf32>
    %69 = arith.mulf %62, %68 : vector<8x256xf32>
    %c0_22 = arith.constant 0 : index
    %c0_23 = arith.constant 0 : index
    %c0_24 = arith.constant 0 : index
    %70 = vector.load %arg6[%c0_22, %c0_23, %c0_24] : memref<1x8x256xf32, #tpu.memory_space<vmem>>, vector<1x8x256xf32>
    %71 = vector.shape_cast %70 : vector<1x8x256xf32> to vector<8x256xf32>
    %72 = vector.shape_cast %69 : vector<8x256xf32> to vector<1x8x256xf32>
    tpu.vector_store %arg6[%c0_22, %c0_23, %c0_24], %72 {strides = array<i32>} : memref<1x8x256xf32, #tpu.memory_space<vmem>>, vector<1x8x256xf32>,
    %c0_25 = arith.constant 0 : index
    %c0_26 = arith.constant 0 : index
    %c0_27 = arith.constant 0 : index
    %73 = vector.load %arg7[%c0_25, %c0_26, %c0_27] : memref<1x8x256xf32, #tpu.memory_space<vmem>>, vector<1x8x256xf32>
    %74 = vector.shape_cast %73 : vector<1x8x256xf32> to vector<8x256xf32>
    %75 = vector.shape_cast %67 : vector<8x256xf32> to vector<1x8x256xf32>
    tpu.vector_store %arg7[%c0_25, %c0_26, %c0_27], %75 {strides = array<i32>} : memref<1x8x256xf32, #tpu.memory_space<vmem>>, vector<1x8x256xf32>,
    return
  }
  func.func @transform_0(%arg0: i32, %arg1: i32) -> (i32, i32, i32) {
    %c0_i32 = arith.constant 0 : i32
    %c0_i32_0 = arith.constant 0 : i32
    return %arg0, %c0_i32, %arg1 : i32, i32, i32
  }
  func.func @transform_1(%arg0: i32, %arg1: i32) -> (i32, i32, i32) {
    %c0_i32 = arith.constant 0 : i32
    %c0_i32_0 = arith.constant 0 : i32
    return %arg0, %c0_i32, %arg1 : i32, i32, i32
  }
  func.func @transform_2(%arg0: i32, %arg1: i32) -> (i32, i32, i32) {
    %c0_i32 = arith.constant 0 : i32
    %c0_i32_0 = arith.constant 0 : i32
    return %arg0, %c0_i32, %arg1 : i32, i32, i32
  }
  func.func @transform_3(%arg0: i32, %arg1: i32) -> (i32, i32) {
    %c0_i32 = arith.constant 0 : i32
    %c0_i32_0 = arith.constant 0 : i32
    %c0_i32_1 = arith.constant 0 : i32
    return %c0_i32, %c0_i32_0 : i32, i32
  }
  func.func @transform_4(%arg0: i32, %arg1: i32) -> (i32, i32, i32) {
    %c0_i32 = arith.constant 0 : i32
    %c0_i32_0 = arith.constant 0 : i32
    return %arg0, %c0_i32, %arg1 : i32, i32, i32
  }
  func.func @transform_5(%arg0: i32, %arg1: i32) -> (i32, i32, i32) {
    %c0_i32 = arith.constant 0 : i32
    %c0_i32_0 = arith.constant 0 : i32
    return %arg0, %c0_i32, %arg1 : i32, i32, i32
  }
}

</mosaic_0001>

<bundles_post_ra>
// kernel: tpu_custom_call.1
= control target key start
LH: loop header
LB: loop body
LE: loop exit
PB: predicated region body
PF: predicated region fallthrough
CT: control target
= control target key end

     0   :  { %s1669_s0 = inlined_call_operand.hbm [shape: f32[2,8,256], index: 0, kind: input, shape index: {}]   ;;  %s1670_s1 = inlined_call_operand.hbm [shape: f32[2,8,256], index: 1, kind: input, shape index: {}]   ;;  %s1671_s2 = inlined_call_operand.hbm [shape: f32[2,8,256], index: 2, kind: input, shape index: {}]   ;;  %s1672_s3 = inlined_call_operand.hbm [shape: f32[32,40], index: 3, kind: input, shape index: {}]   ;;  %s1673_s4 = inlined_call_operand.hbm [shape: f32[2,8,256], index: 4, kind: output, shape index: {0}]   ;;  %s1674_s5 = inlined_call_operand.hbm [shape: f32[2,8,256], index: 5, kind: output, shape index: {1}]  }
   0x1   :  { %1693 = sst [smem:[#allocation24_spill]] %s1670_s1 }
   0x2   :  { %1694 = sst [smem:[#allocation25_spill]] %s1673_s4 }
   0x3   :  { %1695 = sst [smem:[#allocation26_spill]] %s1674_s5 }
   0x4   :  { %11 = vsyncpa [#allocation3], 0 }
   0x5   :  { %13 = vsyncpa [#allocation3 + $0x1], 0 }
   0x6   :  { %14 = vsyncpa [#allocation6], 0 }
   0x7   :  { %16 = vsyncpa [#allocation6 + $0x1], 0 }
   0x8   :  { %17 = vsyncpa [#allocation9], 0 }
   0x9   :  { %18 = vsyncpa [#allocation4], 0 }
   0xa   :  { %20 = vsyncpa [#allocation4 + $0x1], 0 }
   0xb   :  { %21 = vsyncpa [#allocation12], 0 }
   0xc   :  { %23 = vsyncpa [#allocation12 + $0x1], 0  ;;  %s1306_s18 = smov 0   ;;  %s1308_s19 = smov 0  }
   0xd   :  { %s1310_s20 = smov 0   ;;  %s1312_s21 = smov 0  }
   0xe   :  { %s1314_s22 = smov 0   ;;  %s1316_s23 = smov 0  }
   0xf LB: > { %1696 = sst [smem:[#allocation18_spill]] %s1242_s18  ;;  %s41_s24 = sadd.s32 1, %s1258_s22  ;;  %s1262_s23 = sphi %s1316_s23, %s29_s23   ;;  %s1258_s22 = sphi %s1314_s22, %s1733_s22   ;;  %s1254_s21 = sphi %s1312_s21, %s1732_s21   ;;  %s1250_s20 = sphi %s1310_s20, %s1736_s20   ;;  %s1246_s19 = sphi %s1308_s19, %s1735_s19   ;;  %s1242_s18 = sphi %s1306_s18, %s1734_s18  }
  0x10   : > { %1697 = sst [smem:[#allocation19_spill]] %s1258_s22  ;;  %s50_s25 = sadd.s32 1, %s1250_s20 }
  0x11   : > { %1698 = sst [smem:[#allocation20_spill]] %s1262_s23  ;;  %p43_p0 = scmp.ge.s32.totalorder %s41_s24, 2 }
  0x12   : > { %p1675_p1 = scmp.ne.s32.totalorder %s1250_s20, %s1246_s19  ;;  %p58_p2 = scmp.eq.s32.totalorder %s1262_s23, 0 }
  0x13   : > { %s1738_s24 = smov (%p43_p0, %s41_s24), 0  ;;  %p922_p5 = scmp.lt.s32.totalorder %s1262_s23, 2 }
  0x14   : > { %1699 = sst [smem:[#allocation21_spill]] %s1738_s24  ;;  %p59_p4 = por %p58_p2, %p1675_p1 }
  0x15   : > { %s45_s26 = ssub.s32 %s1258_s22, %s1738_s24  ;;  %s1676_s27 = sand.u32 1, %s1250_s20  }
  0x16   : > { %p48_p6 = scmp.eq.s32.totalorder %s45_s26, 0  ;;  %s1353_s28 = sshll.u32 %s1676_s27, 4 }
  0x17   : > { %s1356_s29 = sshll.u32 %s1258_s22, 8  ;;  %p1358_p7 = pnand %p922_p5, %p59_p4 }
  0x18   : > { %s1363_s6 = scalar_select %p48_p6, %s1250_s20, %s50_s25  }
  0x19   : > { %s1700_s30 = scalar_select %p1358_p7, 1, 0 }
  0x1a   : > { %1701 = sst [smem:[#allocation22_spill]] %s1363_s6  ;;  %s254_s7 = sand.u32 1, %s1262_s23  }
  0x1b   : > { %s1702_s1 = sld [smem:[#allocation24_spill]]  ;;  %s258_s11 = scalar_lea.vmem [#allocation5], %s1353_s28 }
  0x1c   : > { %s268_s12 = sshll.u32 %s258_s11, 4  ;;  %s1375_s13 = scalar_lea.sflag [#allocation6], %s254_s7  ;;  %s1373_s12 = int_to_ptr.vmem [resolvable:$true] %s268_s12 }
  0x1d   : > { %p1381_p9 = pneg %p1358_p7 }
  0x1f   : > { %s1703_s15 = scalar_select %p1381_p9, 1, 0 }
  0x21   : > { %s1370_s10 = scalar_lea.hbm %s1702_s1, %s1356_s29  ;;  %s1027_s25 = scalar_lea.hbm %s1702_s1, 512 }
  0x22   : > { %s1022_s14 = scalar_lea.hbm %s1370_s10, 256  ;;  %p1028_p12 = scmp.lt.u32.totalorder %s1370_s10, %s1702_s1 }
  0x23   : > { %p1023_p8 = scmp.ne.s32.totalorder %s1370_s10, %s1022_s14  ;;  %p1029_p13 = scmp.lt.u32.totalorder %s1027_s25, %s1022_s14 }
  0x24   : > { %p1031_p2 = scmp.lt.u32.totalorder %s1022_s14, %s1370_s10 }
  0x25   : > { %p1025_p10 = pnand %p1381_p9, %p1023_p8  ;;  %p1030_p0 = por %p1029_p13, %p1028_p12 }
  0x27   : > { %p1026_p11 = pneg %p1025_p10  ;;  %p1032_p4 = por %p1031_p2, %p1030_p0 }
  0x29   : > { %p1033_p5 = pnand %p1032_p4, %p1026_p11 }
  0x2b   : > { %1036 = shalt.err (!%p1033_p5)
}
  0x2c   : > { %s1037_s7 = scalar_lea.vmem %s1373_s12, 256  ;;  %s1264_s9 = smov [#allocation5]  }
  0x2d   : > { %p1038_p6 = scmp.ne.s32.totalorder %s1373_s12, %s1037_s7  ;;  %s1042_s11 = sshll.u32 %s1264_s9, 4  ;;  %s1043_s11 = int_to_ptr.vmem [resolvable:$false] %s1042_s11 }
  0x2e   : > { %s1044_s16 = scalar_lea.vmem %s1043_s11, 512  ;;  %p1045_p3 = scmp.lt.s32.totalorder %s1373_s12, %s1043_s11 }
  0x2f   : > { %p1040_p8 = pnand %p1038_p6, %p1381_p9  ;;  %p1046_p1 = scmp.lt.s32.totalorder %s1044_s16, %s1037_s7 }
  0x31   : > { %p1041_p10 = pneg %p1040_p8  ;;  %p1047_p12 = por %p1046_p1, %p1045_p3 }
  0x33   : > { %p1048_p13 = pnand %p1047_p12, %p1041_p10 }
  0x35   : > { %1051 = shalt.err (!%p1048_p13)
}
  0x36   : > { %910 = dma.hbm_to_vmem [thread:$0]  (!%p1358_p7), %s1370_s10, 256, %s1373_s12, %s1375_s13  }
  0x37   : > { %s1406_s14 = sadd.s32 4294967295, %s1262_s23   ;;  %s819_s17 = sadd.s32 4294967294, %s1262_s23  }
  0x38   : > { %p63_p1 = scmp.ne.s32.totalorder %s1246_s19, %s1242_s18  ;;  %p1681_p3 = scmp.eq.s32.totalorder %s1406_s14, 0 }
  0x39   : > { %p166_p11 = scmp.eq.s32.totalorder %s1406_s14, 1  ;;  %p172_p0 = scmp.eq.s32.totalorder %s819_s17, 1 }
  0x3a   : > { %p820_p2 = scmp.ge.s32.totalorder %s1262_s23, 1  ;;  %p1416_p4 = por %p1681_p3, %p63_p1 }
  0x3b   : > { %p1705_p5 = scmp.ne.s32.totalorder %s1250_s20, %s1246_s19  ;;  %p1427_p8 = por %p172_p0, %p63_p1 }
  0x3c   : > { %s1704_s25 = scalar_select %p1416_p4, 1, 0 }
  0x3d   : > { %p1423_p6 = por %p166_p11, %p1705_p5  ;;  %p207_p10 = scmp.lt.s32.totalorder %s1262_s23, 3 }
  0x3e   : > { %s1707_s12 = scalar_select %p1427_p8, 1, 0 }
  0x3f   : > { %s1706_s10 = scalar_select %p1423_p6, 1, 0 }
  0x40   : > { %1708 = sst [smem:[#allocation23_spill]] %s1707_s12  ;;  %p1432_p12 = pnand %p820_p2, %p207_p10 }
  0x41   : > { %s1265_s8 = smov [#allocation8]   ;;  %s1450_s17 = scalar_lea.hbm %s1669_s0, %s1356_s29 }
  0x42   : > { %s1709_s26 = scalar_select %p1432_p12, 1, 0 }
  0x43   : > { %s219_s7 = sshll.u32 %s1265_s8, 4  ;;  %p900_p13 = pneg %p1432_p12  ;;  %s1436_s7 = int_to_ptr.vmem [resolvable:$true] %s219_s7 }
  0x44   : > { %s237_s27 = scalar_lea.vmem [#allocation2], %s1353_s28  ;;  %s1052_s22 = scalar_lea.hbm %s1672_s3, 512 }
  0x45   : > { %p1442_p11 = pnand %p900_p13, %p1681_p3  ;;  %s247_s1 = sshll.u32 %s237_s27, 4  ;;  %s1453_s1 = int_to_ptr.vmem [resolvable:$true] %s247_s1 }
  0x46   : > { %p1053_p1 = scmp.ne.s32.totalorder %s1672_s3, %s1052_s22  ;;  %p1059_p10 = scmp.lt.u32.totalorder %s1052_s22, %s1672_s3 }
  0x47   : > { %p1054_p0 = pneg %p1442_p11 }
  0x49   : > { %p1055_p2 = pnand %p1054_p0, %p1053_p1 }
  0x4b   : > { %p1056_p5 = pneg %p1055_p2 }
  0x4d   : > { %p1061_p13 = pnand %p1059_p10, %p1056_p5 }
  0x4f   : > { %1064 = shalt.err (!%p1061_p13)
}
  0x50   : > { %s1065_s27 = scalar_lea.vmem %s1436_s7, 512  ;;  %p1073_p4 = scmp.lt.s32.totalorder %s1436_s7, %s1436_s7 }
  0x51   : > { %p1066_p3 = scmp.ne.s32.totalorder %s1436_s7, %s1065_s27  ;;  %p1074_p12 = scmp.lt.s32.totalorder %s1065_s27, %s1065_s27 }
  0x53   : > { %p1068_p8 = pnand %p1066_p3, %p1054_p0  ;;  %p1075_p7 = por %p1074_p12, %p1073_p4 }
  0x55   : > { %p1069_p6 = pneg %p1068_p8 }
  0x57   : > { %p1076_p9 = pnand %p1075_p7, %p1069_p6 }
  0x59   : > { %1079 = shalt.err (!%p1076_p9)
}
  0x5a   : > { %s1266_s23 = smov 128   ;;  %s1267_s22 = smov 8  }
  0x5b   : > { %903 = dma.hbm_to_vmem [thread:$0]  (!%p1442_p11), %s1672_s3, 512, %s1436_s7, [#allocation9], %s1266_s23, %s1266_s23, %s1267_s22  }
  0x5c   : > { %s1711_s8 = sand.u32 1, %s1250_s20   ;;  %s1080_s16 = scalar_lea.hbm %s1450_s17, 256 }
  0x5d   : > { %s234_s11 = scalar_lea.sflag [#allocation3], %s1711_s8  ;;  %p1081_p7 = scmp.ne.s32.totalorder %s1450_s17, %s1080_s16 }
  0x5e   : > { %p1712_p9 = scmp.ne.s32.totalorder %s1703_s15, 0  ;;  %s1085_s18 = scalar_lea.hbm %s1669_s0, 512 }
  0x5f   : > { %p1086_p6 = scmp.lt.u32.totalorder %s1450_s17, %s1669_s0  ;;  %p1087_p8 = scmp.lt.u32.totalorder %s1085_s18, %s1080_s16 }
  0x60   : > { %p1083_p3 = pnand %p1081_p7, %p1712_p9  ;;  %p1089_p1 = scmp.lt.u32.totalorder %s1080_s16, %s1450_s17 }
  0x61   : > { %p1088_p12 = por %p1087_p8, %p1086_p6 }
  0x62   : > { %p1084_p4 = pneg %p1083_p3 }
  0x63   : > { %p1090_p0 = por %p1089_p1, %p1088_p12 }
  0x65   : > { %p1091_p11 = pnand %p1090_p0, %p1084_p4 }
  0x67   : > { %1094 = shalt.err (!%p1091_p11)
}
  0x68   : > { %s1095_s7 = scalar_lea.vmem %s1453_s1, 256  ;;  %s1268_s12 = smov [#allocation2]  }
  0x69   : > { %p1096_p2 = scmp.ne.s32.totalorder %s1453_s1, %s1095_s7  ;;  %s1100_s9 = sshll.u32 %s1268_s12, 4  ;;  %s1101_s9 = int_to_ptr.vmem [resolvable:$false] %s1100_s9 }
  0x6a   : > { %s1102_s4 = scalar_lea.vmem %s1101_s9, 512  ;;  %p1103_p13 = scmp.lt.s32.totalorder %s1453_s1, %s1101_s9 }
  0x6b   : > { %p1098_p5 = pnand %p1096_p2, %p1712_p9  ;;  %p1104_p7 = scmp.lt.s32.totalorder %s1102_s4, %s1095_s7 }
  0x6d   : > { %p1099_p10 = pneg %p1098_p5  ;;  %p1105_p3 = por %p1104_p7, %p1103_p13 }
  0x6f   : > { %p1106_p6 = pnand %p1105_p3, %p1099_p10 }
  0x71   : > { %1109 = shalt.err (!%p1106_p6)
}
  0x72   : > { %p1713_p4 = scmp.ne.s32.totalorder %s1700_s30, 0  ;;  %s1503_s23 = scalar_lea.hbm %s1671_s2, %s1356_s29 }
  0x73   : > { %s279_s22 = scalar_lea.vmem [#allocation7], %s1353_s28  ;;  %s1110_s6 = scalar_lea.hbm %s1503_s23, 256 }
  0x74   : > { %907 = dma.hbm_to_vmem [thread:$0]  (!%p1713_p4), %s1450_s17, 256, %s1453_s1, %s234_s11  }
  0x75   : > { %s289_s24 = sshll.u32 %s279_s22, 4  ;;  %p1111_p8 = scmp.ne.s32.totalorder %s1503_s23, %s1110_s6  ;;  %s290_s24 = int_to_ptr.vmem [resolvable:$true] %s289_s24 }
  0x76   : > { %s1115_s1 = scalar_lea.hbm %s1671_s2, 512  ;;  %p1116_p0 = scmp.lt.u32.totalorder %s1503_s23, %s1671_s2 }
  0x77   : > { %p1113_p12 = pnand %p1111_p8, %p1712_p9  ;;  %p1117_p11 = scmp.lt.u32.totalorder %s1115_s1, %s1110_s6 }
  0x78   : > { %p1119_p5 = scmp.lt.u32.totalorder %s1110_s6, %s1503_s23 }
  0x79   : > { %p1114_p1 = pneg %p1113_p12  ;;  %p1118_p2 = por %p1117_p11, %p1116_p0 }
  0x7b   : > { %p1120_p10 = por %p1119_p5, %p1118_p2 }
  0x7d   : > { %p1121_p13 = pnand %p1120_p10, %p1114_p1 }
  0x7f   : > { %1124 = shalt.err (!%p1121_p13)
}
  0x80   : > { %s1125_s28 = scalar_lea.vmem %s290_s24, 256  ;;  %s1269_s29 = smov [#allocation7]  }
  0x81   : > { %p1126_p7 = scmp.ne.s32.totalorder %s290_s24, %s1125_s28  ;;  %s1130_s27 = sshll.u32 %s1269_s29, 4  ;;  %s1131_s27 = int_to_ptr.vmem [resolvable:$false] %s1130_s27 }
  0x82   : > { %s1132_s7 = scalar_lea.vmem %s1131_s27, 512  ;;  %p1133_p8 = scmp.lt.s32.totalorder %s290_s24, %s1131_s27 }
  0x83   : > { %p1128_p3 = pnand %p1126_p7, %p1712_p9  ;;  %p1134_p12 = scmp.lt.s32.totalorder %s1132_s7, %s1125_s28 }
  0x85   : > { %p1129_p6 = pneg %p1128_p3  ;;  %p1135_p4 = por %p1134_p12, %p1133_p8 }
  0x87   : > { %p1136_p0 = pnand %p1135_p4, %p1129_p6 }
  0x89   : > { %1139 = shalt.err (!%p1136_p0)
}
  0x8a   : > { %p1714_p11 = scmp.ne.s32.totalorder %s1700_s30, 0  ;;  %p1715_p1 = scmp.ne.s32.totalorder %s1709_s26, 0 }
  0x8b   : > { %s1527_s15 = sand.u32 (!%p1715_p1), 1, %s1246_s19   ;;  %p1716_p9 = scmp.ne.s32.totalorder (!%p1715_p1), %s1704_s25, 0 }
  0x8c   : > { %913 = dma.hbm_to_vmem [thread:$0]  (!%p1714_p11), %s1503_s23, 256, %s290_s24, %s1375_s13  }
  0x8d   : > { %298 = sbr.rel (%p1715_p1) target bundleno = 573 (0x23d), region = 36  ;;  %s1530_s12 = sshll.u32 (!%p1715_p1), %s1527_s15, 4 }
  0x8e   : > { %s301_s9 = scalar_lea.sflag (!%p1715_p1), [#allocation3], %s1527_s15  ;;  %s304_s4 = scalar_lea.vmem (!%p1715_p1), [#allocation2], %s1530_s12 }
  0x94   : > { %1221 = dma.done.wait (%p1716_p9), %s301_s9, 256  }
  0x95   : > { %1223 = vsyncadd (%p1716_p9), %s301_s9, 4294967040  ;;  %s309_s30 = sand.u32 1, %s1406_s14   ;;  %s313_s26 = scalar_lea.vmem [#allocation5], %s1530_s12 }
  0x96   : > { %s310_s13 = scalar_lea.sflag [#allocation6], %s309_s30 }
  0x97   : > { %1225 = dma.done.wait (%p1716_p9), %s310_s13, 512  }
  0x98   : > { %1227 = vsyncadd (%p1716_p9), %s310_s13, 4294966784  ;;  %s322_s5 = scalar_lea.vmem [#allocation7], %s1530_s12  ;;  %p1717_p4 = scmp.eq.s32.totalorder %s1406_s14, 0 }
  0x9a   : > { %1229 = dma.done.wait (%p1717_p4), [#allocation9], 512   ;;  %p1718_p2 = pmov %p1717_p4 }
  0x9b   : > { %v373_v0 = vld [vmem:[%s304_s4] sm:$0xff]  ;;  %v374_v1 = vld [vmem:[%s304_s4 + $0x8] sm:$0xff]  ;;  %s1270_s18 = smov 127   ;;  %s1271_s23 = smov 1   ;;  %v1272_v6 = vmov 0.0   ;;  %v377_v7 = vlaneseq  ;;  %vm1273_vm3 = vmmov 1  }
  0x9c   : > { %1231 = vsyncadd (%p1718_p2), [#allocation9], 4294966784  ;;  %v375_v2 = vld [vmem:[%s313_s26] sm:$0xff]  ;;  %v980_v3 = vpack.i.bf16 %v374_v1, %v373_v0  ;;  %v376_v4 = vld [vmem:[%s313_s26 + $0x8] sm:$0xff]  ;;  %523 = vmatprep.mubr.f32.mxu0 %v1272_v6  ;;  %535 = vmatprep.mubr.f32.mxu1 %v1272_v6  ;;  %vm446_vm9 = vcmask 326656   ;;  %s866_s14 = sshll.u32 %s1254_s21, 8 }
  0x9d   : > { %429 = vrot.lane.b32.xlu1 %v375_v2, %s1270_s18  ;;  %v985_v5 = vpack.i.bf16 %v376_v4, %v375_v2  ;;  %v378_v8 = vand.u32 127, %v377_v7  ;;  %v442_v31 = vld [vmem:[#allocation8] sm:$0xff]  ;;  %v444_v32 = vld [vmem:[#allocation8 + $0x10] sm:$0xff]  ;;  %v443_v34 = vld [vmem:[#allocation8 + $0x8] sm:$0xff]  ;;  %s367_s25 = scalar_lea.vmem [#allocation11], %s1530_s12  ;;  %s1723_s8 = sld [smem:[#allocation26_spill]] }
  0x9e   : > { %981 = vrot.lane.b32.xlu0 %v980_v3, %s1271_s23  ;;  %v445_v35 = vld [vmem:[#allocation8 + $0x18] sm:$0xff]  ;;  %s640_s22 = sshll.u32 %s367_s25, 4  ;;  %s608_s1 = scalar_lea.sflag [#allocation12], %s1527_s15  ;;  %s1590_s22 = int_to_ptr.vmem [resolvable:$true] %s640_s22 }
  0x9f   : > { %v379_v9 = vadd.s32 128, %v378_v8  ;;  %v384_v11 = vand.u32 15, %v378_v8  ;;  %vm412_vm0 = vcmp.lt.s32.totalorder %v378_v8, 1  ;;  %vm433_vm6 = vcmp.lt.s32.totalorder %v378_v8, 127  ;;  %v587_v3 = vld [vmem:[%s322_s5 + $0x8] sm:$0xff]  ;;  %s1140_s17 = scalar_lea.vmem %s1590_s22, 256 }
  0xa0   : > { %p1141_p5 = scmp.ne.s32.totalorder %s1590_s22, %s1140_s17  ;;  %p1724_p10 = scmp.ne.s32.totalorder %s1706_s10, 0 }
  0xa1   : > { %431 = vrot.lane.b32.xlu1 %v376_v4, %s1270_s18  ;;  %v391_v10 = vand.u32 15, %v379_v9  ;;  %vm404_vm2 = vcmp.ne.s32.totalorder %v384_v11, 0  ;;  %vm406_vm8 = vcmp.ne.s32.totalorder %v384_v11, 15  ;;  %s1274_s11 = smov [#allocation11]  }
  0xa2   : > { %986 = vrot.lane.b32.xlu0 %v985_v5, %s1271_s23  ;;  %vm1555_vm5 = vmpackc.low %vm1273_vm3, %vm404_vm2  ;;  %p1142_p13 = pnand %p1141_p5, %p1724_p10  ;;  %s1144_s28 = sshll.u32 %s1274_s11, 4  ;;  %s1145_s28 = int_to_ptr.vmem [resolvable:$false] %s1144_s28 }
  0xa3   : > { %vm405_vm1 = vcmp.ne.s32.totalorder %v391_v10, 0  ;;  %vm407_vm7 = vcmp.ne.s32.totalorder %v391_v10, 15  ;;  %s1588_s16 = scalar_lea.hbm %s1723_s8, %s866_s14  ;;  %s1146_s29 = scalar_lea.vmem %s1145_s28, 512 }
  0xa4   : > { %vm1550_vm4 = vmpackc.low %vm1273_vm3, %vm405_vm1  ;;  %p1143_p7 = pneg %p1142_p13  ;;  %p1147_p3 = scmp.lt.s32.totalorder %s1590_s22, %s1145_s28 }
  0xa5   : > { %p1148_p6 = scmp.lt.s32.totalorder %s1146_s29, %s1140_s17 }
  0xa7   : > { %p1149_p8 = por %p1148_p6, %p1147_p3 }
  0xa9   : > { %p1150_p12 = pnand %p1149_p8, %p1143_p7 }
 0x10f   : > { %v430_v15 = vpop.permute.xlu1 %429 }
 0x110   : > { %v982_v12 = vpop.permute.xlu0 %981 }
 0x111   : > { %v984_v13 = vunpack.i.h.bf16 %v982_v12  ;;  %v983_v14 = vunpack.i.l.bf16 %v982_v12 }
 0x113   : > { %v413_v16 = vsel %vm412_vm0, %v983_v14, %v984_v13  ;;  %v414_v18 = vsel %vm412_vm0, %v984_v13, %v983_v14  ;;  %v432_v29 = vpop.permute.xlu1 %431 }
 0x114   : > { %v987_v19 = vpop.permute.xlu0 %986  ;;  %v868_v20 = vpack.c.bf16 %v374_v1, %v413_v16  ;;  %v871_v21 = vpack.c.bf16 %v373_v0, %v414_v18  ;;  %v435_v30 = vsel %vm433_vm6, %v432_v29, %v430_v15  ;;  %v434_v33 = vsel %vm433_vm6, %v430_v15, %v432_v29  ;;  %v586_v1 = vld [vmem:[%s322_s5] sm:$0xff] }
 0x115   : > { %v989_v23 = vunpack.i.h.bf16 %v987_v19  ;;  %v988_v24 = vunpack.i.l.bf16 %v987_v19 }
 0x116   : > { %870 = vmatprep.subr.msk.bf16.mxu0 %vm1550_vm4, %v868_v20  ;;  %880 = vmatprep.subr.msk.bf16.mxu1 %vm1550_vm4, %v868_v20 }
 0x117   : > { %v425_v25 = vsel %vm412_vm0, %v988_v24, %v989_v23  ;;  %v426_v26 = vsel %vm412_vm0, %v989_v23, %v988_v24  ;;  %873 = vmatpush1.bf16.msk.msra.mxu0 %vm1555_vm5, %v871_v21  ;;  %883 = vmatpush1.bf16.msk.msra.mxu1 %vm1555_vm5, %v871_v21 }
 0x118   : > { %v874_v27 = vpack.c.bf16 %v376_v4, %v425_v25  ;;  %v877_v28 = vpack.c.bf16 %v375_v2, %v426_v26 }
 0x11a   : > { %876 = vmatprep.subr.msk.bf16.mxu0 %vm1550_vm4, %v874_v27  ;;  %881 = vmatprep.subr.msk.bf16.mxu1 %vm1550_vm4, %v874_v27 }
 0x11b   : > { %879 = vmatpush1.bf16.msk.msra.mxu0 %vm1555_vm5, %v877_v28  ;;  %884 = vmatpush1.bf16.msk.msra.mxu1 %vm1555_vm5, %v877_v28 }
 0x11c   : > { %843 = vmatprep.subr.msk.mxu0 %vm407_vm7, %v435_v30  ;;  %882 = vmatprep.subr.msk.mxu1 %vm407_vm7, %v435_v30 }
 0x11f   : > { %844 = vmatpush1.msk.msra.mxu0 %vm406_vm8, %v434_v33  ;;  %885 = vmatpush1.msk.msra.mxu1 %vm406_vm8, %v434_v33 }
 0x120   : > { %845 = vmatmul.mubr.msk.f32.vlgmr.msra.gmra.mrb[0].mxu0 %vm446_vm9, %v442_v31  ;;  %847 = vmatmul.mubr.msk.f32.vlgmr.msra.gmra.mrb[0].mxu1 %vm446_vm9, %v444_v32 }
 0x121   : > { %529 = vmatprep.mubr.f32.mxu0 %v1272_v6  ;;  %541 = vmatprep.mubr.f32.mxu1 %v1272_v6 }
 0x124   : > { %846 = vmatmul.mubr.msk.f32.gmra.mrb[2].mxu0 %vm446_vm9, %v443_v34  ;;  %848 = vmatmul.mubr.msk.f32.gmra.mrb[2].mxu1 %vm446_vm9, %v445_v35 }
 0x1f3   : > { %v525_v36 = vpop.f32.mrb[0].mxu0  ;;  %v537_v37 = vpop.f32.mrb[0].mxu1 }
 0x1f4   : > { %v849_v38 = vmul.f32 -1.442695, %v525_v36  ;;  %v527_v39 = vpop.f32.mrb[1].mxu0  ;;  %v539_v40 = vpop.f32.mrb[1].mxu1 }
 0x1f5   : > { %v850_v41 = vmul.f32 -1.442695, %v527_v39 }
 0x1f6   : > { %990 = vpow2.f32 %v849_v38 }
 0x1f7   : > { %992 = vpow2.f32 %v850_v41  ;;  %v531_v42 = vpop.f32.mrb[2].mxu0  ;;  %v543_v43 = vpop.f32.mrb[2].mxu1 }
 0x1f8   : > { %v851_v44 = vmul.f32 -1.442695, %v531_v42  ;;  %v533_v45 = vpop.f32.mrb[3].mxu0  ;;  %v545_v46 = vpop.f32.mrb[3].mxu1  ;;  %v853_v48 = vmul.f32 -1.442695, %v543_v43 }
 0x1f9   : > { %v852_v47 = vmul.f32 -1.442695, %v533_v45  ;;  %v854_v49 = vmul.f32 -1.442695, %v545_v46 }
 0x1fa   : > { %994 = vpow2.f32 %v851_v44 }
 0x1fb   : > { %996 = vpow2.f32 %v852_v47 }
 0x1fc   : > { %998 = vtanh.f32 %v537_v37 }
 0x1fd   : > { %1000 = vtanh.f32 %v539_v40 }
 0x1fe   : > { %1002 = vpow2.f32 %v853_v48 }
 0x1ff   : > { %1004 = vpow2.f32 %v854_v49 }
 0x200   : > { %v991_v50 = vpop.eup %990 }
 0x201   : > { %v993_v51 = vpop.eup %992  ;;  %v554_v52 = vadd.f32 1.0, %v991_v50 }
 0x202   : > { %v555_v53 = vadd.f32 1.0, %v993_v51 }
 0x203   : > { %1006 = vrcp.f32 %v554_v52 }
 0x204   : > { %v995_v54 = vpop.eup %994  ;;  %1008 = vrcp.f32 %v555_v53 }
 0x205   : > { %v997_v55 = vpop.eup %996  ;;  %v566_v56 = vadd.f32 1.0, %v995_v54 }
 0x206   : > { %v567_v57 = vadd.f32 1.0, %v997_v55  ;;  %v999_v58 = vpop.eup %998 }
 0x207   : > { %1010 = vrcp.f32 %v566_v56  ;;  %v1001_v59 = vpop.eup %1000 }
 0x208   : > { %1012 = vrcp.f32 %v567_v57  ;;  %v1003_v60 = vpop.eup %1002 }
 0x209   : > { %v1005_v61 = vpop.eup %1004  ;;  %v580_v4 = vadd.f32 1.0, %v1003_v60 }
 0x20a   : > { %v581_v6 = vadd.f32 1.0, %v1005_v61 }
 0x20b   : > { %1014 = vrcp.f32 %v580_v4 }
 0x20c   : > { %1016 = vrcp.f32 %v581_v6 }
 0x20d   : > { %v1007_v62 = vpop.eup %1006 }
 0x20e   : > { %v1009_v63 = vpop.eup %1008  ;;  %v590_v0 = vmul.f32 %v1007_v62, %v999_v58 }
 0x20f   : > { %v591_v2 = vmul.f32 %v1009_v63, %v1001_v59 }
 0x211   : > { %v1011_v5 = vpop.eup %1010 }
 0x212   : > { %v1013_v7 = vpop.eup %1012  ;;  %v588_v8 = vmul.f32 %v1011_v5, %v586_v1 }
 0x213   : > { %v589_v9 = vmul.f32 %v1013_v7, %v587_v3 }
 0x214   : > { %v592_v10 = vadd.f32 %v590_v0, %v588_v8 }
 0x215   : > { %v593_v11 = vadd.f32 %v591_v2, %v589_v9 }
 0x216   : > { %1018 = vtanh.f32 %v592_v10  ;;  %600 = vst [vmem:[%s367_s25] sm:$0xff] %v592_v10 }
 0x217   : > { %1020 = vtanh.f32 %v593_v11  ;;  %601 = vst [vmem:[%s367_s25 + $0x8] sm:$0xff] %v593_v11 }
 0x218   : > { %1153 = shalt.err (!%p1150_p12)
}
 0x219   : > { %s1154_s27 = scalar_lea.hbm %s1588_s16, 256  ;;  %s1158_s4 = scalar_lea.hbm %s1723_s8, 512 }
 0x21a   : > { %p1155_p0 = scmp.ne.s32.totalorder %s1588_s16, %s1154_s27  ;;  %p1159_p9 = scmp.lt.u32.totalorder %s1588_s16, %s1723_s8 }
 0x21b   : > { %p1160_p4 = scmp.lt.u32.totalorder %s1158_s4, %s1154_s27  ;;  %p1162_p5 = scmp.lt.u32.totalorder %s1154_s27, %s1588_s16 }
 0x21c   : > { %p1156_p11 = pnand %p1155_p0, %p1724_p10 }
 0x21d   : > { %p1161_p2 = por %p1160_p4, %p1159_p9 }
 0x21e   : > { %p1157_p1 = pneg %p1156_p11 }
 0x21f   : > { %p1163_p13 = por %p1162_p5, %p1161_p2 }
 0x221   : > { %p1164_p7 = pnand %p1163_p13, %p1157_p1 }
 0x223   : > { %1167 = shalt.err (!%p1164_p7)
}
 0x224   : > { %897 = dma.vmem_to_hbm [thread:$0]  (%p1724_p10), %s1590_s22, 256, %s1588_s16, %s608_s1   ;;  %v1015_v12 = vpop.eup %1014 }
 0x225   : > { %v1017_v13 = vpop.eup %1016  ;;  %s360_s26 = scalar_lea.vmem [#allocation10], %s1530_s12  ;;  %s1725_s25 = sld [smem:[#allocation25_spill]] }
 0x226   : > { %s624_s5 = sshll.u32 %s360_s26, 4  ;;  %v1019_v14 = vpop.eup %1018  ;;  %s603_s22 = scalar_lea.sflag [#allocation4], %s1527_s15  ;;  %s1622_s5 = int_to_ptr.vmem [resolvable:$true] %s624_s5 }
 0x227   : > { %v1021_v15 = vpop.eup %1020  ;;  %v596_v16 = vmul.f32 %v1019_v14, %v1015_v12  ;;  %s1168_s12 = scalar_lea.vmem %s1622_s5, 256  ;;  %s1275_s6 = smov [#allocation10]  }
 0x228   : > { %v597_v17 = vmul.f32 %v1021_v15, %v1017_v13  ;;  %p1169_p3 = scmp.ne.s32.totalorder %s1622_s5, %s1168_s12  ;;  %s1172_s21 = sshll.u32 %s1275_s6, 4  ;;  %s1173_s21 = int_to_ptr.vmem [resolvable:$false] %s1172_s21 }
 0x229   : > { %598 = vst [vmem:[%s360_s26] sm:$0xff] %v596_v16  ;;  %s1174_s16 = scalar_lea.vmem %s1173_s21, 512  ;;  %p1175_p12 = scmp.lt.s32.totalorder %s1622_s5, %s1173_s21 }
 0x22a   : > { %599 = vst [vmem:[%s360_s26 + $0x8] sm:$0xff] %v597_v17  ;;  %p1170_p6 = pnand %p1169_p3, %p1724_p10  ;;  %p1176_p0 = scmp.lt.s32.totalorder %s1174_s16, %s1168_s12 }
 0x22b   : > { %s1620_s24 = scalar_lea.hbm %s1725_s25, %s866_s14 }
 0x22c   : > { %p1171_p8 = pneg %p1170_p6  ;;  %p1177_p11 = por %p1176_p0, %p1175_p12 }
 0x22e   : > { %p1178_p1 = pnand %p1177_p11, %p1171_p8 }
 0x230   : > { %1181 = shalt.err (!%p1178_p1)
}
 0x231   : > { %s1182_s15 = scalar_lea.hbm %s1620_s24, 256  ;;  %s1186_s17 = scalar_lea.hbm %s1725_s25, 512 }
 0x232   : > { %p1183_p9 = scmp.ne.s32.totalorder %s1620_s24, %s1182_s15  ;;  %p1187_p5 = scmp.lt.u32.totalorder %s1620_s24, %s1725_s25 }
 0x233   : > { %p1188_p13 = scmp.lt.u32.totalorder %s1186_s17, %s1182_s15  ;;  %p1190_p3 = scmp.lt.u32.totalorder %s1182_s15, %s1620_s24 }
 0x234   : > { %p1184_p4 = pnand %p1183_p9, %p1724_p10 }
 0x235   : > { %p1189_p7 = por %p1188_p13, %p1187_p5 }
 0x236   : > { %p1185_p2 = pneg %p1184_p4 }
 0x237   : > { %p1191_p6 = por %p1190_p3, %p1189_p7 }
 0x239   : > { %p1192_p8 = pnand %p1191_p6, %p1185_p2 }
 0x23b   : > { %1195 = shalt.err (!%p1192_p8)
}
 0x23c   : > { %896 = dma.vmem_to_hbm [thread:$0]  (%p1724_p10), %s1622_s5, 256, %s1620_s24, %s603_s22  }
 0x23d PF: > { %s1726_s29 = sld [smem:[#allocation18_spill]]  ;;  %s1727_s27 = sld [smem:[#allocation23_spill]] }
 0x23e   : > { %s1728_s7 = sld [smem:[#allocation20_spill]] }
 0x243   : > { %s652_s9 = sand.u32 1, %s1726_s29   ;;  %p1729_p12 = scmp.ne.s32.totalorder %s1727_s27, 0 }
 0x244   : > { %p1730_p0 = scmp.ge.s32.totalorder %s1728_s7, 2  ;;  %s653_s4 = scalar_lea.sflag [#allocation4], %s652_s9 }
 0x246   : > { %p915_p11 = pnand %p1730_p0, %p1729_p12 }
 0x248   : > { %1233 = dma.done.wait (!%p915_p11), %s653_s4, 256  }
 0x249   : > { %1235 = vsyncadd (!%p915_p11), %s653_s4, 4294967040  ;;  %s662_s30 = scalar_lea.sflag [#allocation12], %s652_s9 }
 0x24a   : > { %1237 = dma.done.wait (!%p915_p11), %s662_s30, 256  }
 0x24b   : > { %1239 = vsyncadd (!%p915_p11), %s662_s30, 4294967040  ;;  %s29_s23 = sadd.s32 1, %s1728_s7   ;;  %s1731_s10 = sld [smem:[#allocation22_spill]] }
 0x24c   : > { %p26_p1 = scmp.ge.s32.totalorder %s29_s23, 4   ;;  %s1732_s21 = sld [smem:[#allocation19_spill]] }
 0x24d   : > { %s1733_s22 = sld [smem:[#allocation21_spill]]  ;;  %s1734_s18 = smov %s1246_s19 }
 0x24e   : > { %s1735_s19 = smov %s1250_s20  ;;  %28 = sbr.rel (!%p26_p1) target bundleno = 15 (0xf), region = 126 }
 0x251   : > { %s1736_s20 = smov %s1731_s10 }
 0x255   :  { %667 = vsyncpa [#allocation3], 1 }
 0x256   :  { %669 = vsyncpa [#allocation3 + $0x1], 1 }
 0x257   :  { %670 = vsyncpa [#allocation6], 1 }
 0x258   :  { %672 = vsyncpa [#allocation6 + $0x1], 1 }
 0x259   :  { %673 = vsyncpa [#allocation9], 1 }
 0x25a   :  { %674 = vsyncpa [#allocation4], 1 }
 0x25b   :  { %676 = vsyncpa [#allocation4 + $0x1], 1 }
 0x25c   :  { %677 = vsyncpa [#allocation12], 1 }
 0x25d   :  { %679 = vsyncpa [#allocation12 + $0x1], 1 }

</bundles_post_ra>
